<compile_context>
chip_gen: v5e
topology: v5e:2x2
jax: 0.10.0
libtpu: 0.0.40
codegen_flags: <defaults>
</compile_context>

<pallas_src>
import jax
import jax.numpy as jnp
from jax.experimental import pallas as pl
from jax.experimental.pallas import tpu as pltpu


def critic_kernel(s_ref, a_ref, w1_ref, b1_ref, w2_ref, b2_ref, w3_ref, b3_ref,
                  o_ref):
    # Layer 1: in-kernel lane concat (cheap select/shift; XLU slot is idle here),
    # then ONE K = S+A MXU dot with f32 accumulation.
    x = jnp.concatenate([s_ref[...], a_ref[...]], axis=-1).astype(jnp.bfloat16)
    h1 = jnp.dot(x, w1_ref[...], preferred_element_type=jnp.float32)
    h1 = jnp.maximum(h1 + b1_ref[...], 0.0)

    # Layer 2: (tb, 256) @ (256, 256), bf16 MXU inputs, f32 accumulation.
    h2 = jnp.dot(h1.astype(jnp.bfloat16), w2_ref[...],
                 preferred_element_type=jnp.float32)
    h2 = jnp.maximum(h2 + b2_ref[...], 0.0)

    # Layer 3 (256 -> 1): VPU multiply + lane reduction; emit a lane-dense row.
    out = jnp.sum(h2 * w3_ref[...], axis=-1) + b3_ref[0]     # (tb,)
    o_ref[...] = out[None, :].astype(o_ref.dtype)             # (1, tb)


def _pick_tile(B, tile_b):
    """Sublane/lane-aligned batch tile.

    Small B  -> one full tile (multiple of 8).
    Large B  -> lane-dense tile (multiple of 128), capped at tile_b and at
                ~B/2 so the grid has >= 2 steps (v7x has 2 TensorCores).
    """
    if B <= 256:
        return max(8, ((B + 7) // 8) * 8)
    half = (B + 1) // 2
    tb = max(128, (half // 128) * 128)
    return min(tile_b, tb)


def critic_forward(state, action, params, *, tile_b=2048):
    """state: (B, S), action: (B, A) f32. Returns (B, 1) f32 critic value."""
    w1, b1, w2, b2, w3, b3 = params
    B, S = state.shape
    A = action.shape[1]

    tb = _pick_tile(B, tile_b)
    B_pad = ((B + tb - 1) // tb) * tb
    if B_pad != B:
        pad = B_pad - B
        state = jnp.pad(state, ((0, pad), (0, 0)))
        action = jnp.pad(action, ((0, pad), (0, 0)))

    grid = (B_pad // tb,)

    def resident(shape):
        # Full-array block whose index never changes -> stays VMEM-resident.
        # (Weights total ~160 KiB, so default double-buffering is harmless.)
        return pl.BlockSpec(shape, lambda i: (0, 0))

    flops = 2 * B_pad * ((S + A) * 256 + 256 * 256 + 256) + 4 * B_pad * 256
    bytes_accessed = (B_pad * (S + A) * 4 + B_pad * 4
                      + (w1.size + w2.size) * 2
                      + (b1.size + b2.size + w3.size + b3.size) * 4)

    out = pl.pallas_call(
        critic_kernel,
        out_shape=jax.ShapeDtypeStruct((1, B_pad), jnp.float32),
        grid=grid,
        in_specs=[
            pl.BlockSpec((tb, S), lambda i: (i, 0)),             # state tile
            pl.BlockSpec((tb, A), lambda i: (i, 0)),             # action tile
            resident((S + A, 256)),                              # w1, bf16
            resident((1, 256)),                                  # b1, f32
            resident((256, 256)),                                # w2, bf16
            resident((1, 256)),                                  # b2, f32
            resident((1, 256)),                                  # w3 row, f32 (VPU)
            pl.BlockSpec(memory_space=pltpu.MemorySpace.SMEM),   # b3 scalar
        ],
        out_specs=pl.BlockSpec((1, tb), lambda i: (0, i)),       # lane-dense row
        compiler_params=pltpu.CompilerParams(
            dimension_semantics=("parallel",),
            vmem_limit_bytes=32 * 1024 * 1024,
        ),
        cost_estimate=pl.CostEstimate(
            flops=flops, transcendentals=0, bytes_accessed=bytes_accessed),
    )(state, action, w1, b1, w2, b2, w3, b3)

    return out[0, :B][:, None]


def orthogonal(key, out_dim, in_dim):
    """Deterministic orthogonal init (same semantics as nn.init.orthogonal_)."""
    a = jax.random.normal(key, (out_dim, in_dim), dtype=jnp.float32)
    flat = a if out_dim >= in_dim else a.T
    q, r = jnp.linalg.qr(flat)
    q = q * jnp.sign(jnp.diag(r))  # make decomposition unique
    if out_dim < in_dim:
        q = q.T
    return q[:out_dim, :in_dim]


def make_params(key, state_dim, action_dim):
    in_dim = state_dim + action_dim
    k1, k2, k3 = jax.random.split(key, 3)
    # Torch Linear weight is (out, in); kernel consumes the transpose (in, out).
    w1 = orthogonal(k1, 256, in_dim).T.astype(jnp.bfloat16)   # (S+A, 256) bf16 (MXU)
    b1 = jnp.zeros((1, 256), jnp.float32)
    w2 = orthogonal(k2, 256, 256).T.astype(jnp.bfloat16)      # (256, 256) bf16 (MXU)
    b2 = jnp.zeros((1, 256), jnp.float32)
    w3 = orthogonal(k3, 1, 256)                               # (1, 256) f32 row (VPU)
    b3 = jnp.zeros((1,), jnp.float32)                         # scalar in SMEM
    return (w1, b1, w2, b2, w3, b3)


def _reference(state, action, params):
    # Plain-JAX reference with the same stored (bf16) weights upcast to f32.
    w1, b1, w2, b2, w3, b3 = params
    x = jnp.concatenate([state, action], axis=1)
    h1 = jnp.maximum(x @ w1.astype(jnp.float32) + b1, 0.0)
    h2 = jnp.maximum(h1 @ w2.astype(jnp.float32) + b2, 0.0)
    return h2 @ w3.astype(jnp.float32).T + b3


if __name__ == "__main__":
    key = jax.random.PRNGKey(0)
    k_state, k_action, k_params, k_big = jax.random.split(key, 4)

    batch, state_dim, action_dim = 2, 8, 8
    state = jax.random.normal(k_state, (batch, state_dim), dtype=jnp.float32)
    action = jax.random.normal(k_action, (batch, action_dim), dtype=jnp.float32)
    params = make_params(k_params, state_dim, action_dim)

    out = critic_forward(state, action, params)
    jax.block_until_ready(out)

    ref = _reference(state, action, params)
    assert out.shape == (batch, 1)
    assert jnp.allclose(out, ref, atol=3e-2, rtol=3e-2), (out, ref)

    # Second check: multi-tile grid with a ragged tail (exercises padding path
    # and the lane-dense multi-step output).
    kb1, kb2 = jax.random.split(k_big)
    big_b = 300
    state_b = jax.random.normal(kb1, (big_b, state_dim), dtype=jnp.float32)
    action_b = jax.random.normal(kb2, (big_b, action_dim), dtype=jnp.float32)
    out_b = critic_forward(state_b, action_b, params)
    jax.block_until_ready(out_b)
    ref_b = _reference(state_b, action_b, params)
    assert out_b.shape == (big_b, 1)
    assert jnp.allclose(out_b, ref_b, atol=3e-2, rtol=3e-2)

    print("KERNEL_OK")
</pallas_src>

<mosaic_0001>
module attributes {stable_mosaic.version = 11 : i64} {
  func.func @critic_kernel(%arg0: i32, %arg1: memref<8x8xf32, #tpu.memory_space<vmem>>, %arg2: memref<8x8xf32, #tpu.memory_space<vmem>>, %arg3: memref<16x256xbf16, #tpu.memory_space<vmem>>, %arg4: memref<1x256xf32, #tpu.memory_space<vmem>>, %arg5: memref<256x256xbf16, #tpu.memory_space<vmem>>, %arg6: memref<1x256xf32, #tpu.memory_space<vmem>>, %arg7: memref<1x256xf32, #tpu.memory_space<vmem>>, %arg8: memref<1xf32, #tpu.memory_space<smem>>, %arg9: memref<1x8xf32, #tpu.memory_space<vmem>>) attributes {dimension_semantics = [#tpu.dimension_semantics<parallel>], iteration_bounds = array<i64: 1>, scalar_prefetch = 0 : i64, scratch_operands = 0 : i64, tpu.core_type = #tpu.core_type<tc>, window_params = [{transform_indices = @transform_0, window_bounds = array<i64: 8, 8>}, {transform_indices = @transform_1, window_bounds = array<i64: 8, 8>}, {pipeline_mode = #tpu.pipeline_mode<synchronous>, transform_indices = @transform_2, window_bounds = array<i64: 16, 256>}, {pipeline_mode = #tpu.pipeline_mode<synchronous>, transform_indices = @transform_3, window_bounds = array<i64: 1, 256>}, {pipeline_mode = #tpu.pipeline_mode<synchronous>, transform_indices = @transform_4, window_bounds = array<i64: 256, 256>}, {pipeline_mode = #tpu.pipeline_mode<synchronous>, transform_indices = @transform_5, window_bounds = array<i64: 1, 256>}, {pipeline_mode = #tpu.pipeline_mode<synchronous>, transform_indices = @transform_6, window_bounds = array<i64: 1, 256>}, {transform_indices = @transform_7, window_bounds = array<i64: 1>}, {transform_indices = @transform_8, window_bounds = array<i64: 1, 8>}]} {
    %c0 = arith.constant 0 : index
    %c0_0 = arith.constant 0 : index
    %0 = vector.load %arg1[%c0, %c0_0] : memref<8x8xf32, #tpu.memory_space<vmem>>, vector<8x8xf32>
    %c0_1 = arith.constant 0 : index
    %c0_2 = arith.constant 0 : index
    %1 = vector.load %arg2[%c0_1, %c0_2] : memref<8x8xf32, #tpu.memory_space<vmem>>, vector<8x8xf32>
    %2 = tpu.concatenate %0, %1 in 1 : vector<8x8xf32>, vector<8x8xf32> -> vector<8x16xf32>
    %3 = arith.truncf %2 : vector<8x16xf32> to vector<8x16xbf16>
    %c0_3 = arith.constant 0 : index
    %c0_4 = arith.constant 0 : index
    %4 = vector.load %arg3[%c0_3, %c0_4] : memref<16x256xbf16, #tpu.memory_space<vmem>>, vector<16x256xbf16>
    %cst = arith.constant dense<0.000000e+00> : vector<8x256xf32>
    %5 = tpu.matmul %3, %4, %cst {dimension_numbers = #tpu.dot_dimension_numbers<[1], [0], [0], [1], [0, 0, 1, 1], [], []>} : vector<8x16xbf16>, vector<16x256xbf16>, vector<8x256xf32> -> vector<8x256xf32>
    %c0_5 = arith.constant 0 : index
    %c0_6 = arith.constant 0 : index
    %6 = vector.load %arg4[%c0_5, %c0_6] : memref<1x256xf32, #tpu.memory_space<vmem>>, vector<1x256xf32>
    %7 = vector.broadcast %6 : vector<1x256xf32> to vector<8x256xf32>
    %8 = arith.addf %5, %7 : vector<8x256xf32>
    %cst_7 = arith.constant 0.000000e+00 : f32
    %9 = vector.broadcast %cst_7 : f32 to vector<8x256xf32>
    %10 = arith.maximumf %8, %9 : vector<8x256xf32>
    %11 = arith.truncf %10 : vector<8x256xf32> to vector<8x256xbf16>
    %c0_8 = arith.constant 0 : index
    %c0_9 = arith.constant 0 : index
    %12 = vector.load %arg5[%c0_8, %c0_9] : memref<256x256xbf16, #tpu.memory_space<vmem>>, vector<256x256xbf16>
    %cst_10 = arith.constant dense<0.000000e+00> : vector<8x256xf32>
    %13 = tpu.matmul %11, %12, %cst_10 {dimension_numbers = #tpu.dot_dimension_numbers<[1], [0], [0], [1], [0, 0, 1, 1], [], []>} : vector<8x256xbf16>, vector<256x256xbf16>, vector<8x256xf32> -> vector<8x256xf32>
    %c0_11 = arith.constant 0 : index
    %c0_12 = arith.constant 0 : index
    %14 = vector.load %arg6[%c0_11, %c0_12] : memref<1x256xf32, #tpu.memory_space<vmem>>, vector<1x256xf32>
    %15 = vector.broadcast %14 : vector<1x256xf32> to vector<8x256xf32>
    %16 = arith.addf %13, %15 : vector<8x256xf32>
    %cst_13 = arith.constant 0.000000e+00 : f32
    %17 = vector.broadcast %cst_13 : f32 to vector<8x256xf32>
    %18 = arith.maximumf %16, %17 : vector<8x256xf32>
    %c0_14 = arith.constant 0 : index
    %c0_15 = arith.constant 0 : index
    %19 = vector.load %arg7[%c0_14, %c0_15] : memref<1x256xf32, #tpu.memory_space<vmem>>, vector<1x256xf32>
    %20 = vector.broadcast %19 : vector<1x256xf32> to vector<8x256xf32>
    %21 = arith.mulf %18, %20 : vector<8x256xf32>
    %cst_16 = arith.constant dense<0.000000e+00> : vector<8xf32>
    %22 = vector.multi_reduction <add>, %21, %cst_16 [1] : vector<8x256xf32> to vector<8xf32>
    %c0_17 = arith.constant 0 : index
    %23 = memref.load %arg8[%c0_17] : memref<1xf32, #tpu.memory_space<smem>>
    %24 = vector.broadcast %23 : f32 to vector<8xf32>
    %25 = arith.addf %22, %24 : vector<8xf32>
    %26 = vector.shape_cast %25 : vector<8xf32> to vector<1x8xf32>
    %c0_18 = arith.constant 0 : index
    %c0_19 = arith.constant 0 : index
    %27 = vector.load %arg9[%c0_18, %c0_19] : memref<1x8xf32, #tpu.memory_space<vmem>>, vector<1x8xf32>
    tpu.vector_store %arg9[%c0_18, %c0_19], %26 {strides = array<i32>} : memref<1x8xf32, #tpu.memory_space<vmem>>, vector<1x8xf32>,
    return
  }
  func.func @transform_0(%arg0: i32) -> (i32, i32) {
    %c0_i32 = arith.constant 0 : i32
    %c0_i32_0 = arith.constant 0 : i32
    return %arg0, %c0_i32 : i32, i32
  }
  func.func @transform_1(%arg0: i32) -> (i32, i32) {
    %c0_i32 = arith.constant 0 : i32
    %c0_i32_0 = arith.constant 0 : i32
    return %arg0, %c0_i32 : i32, i32
  }
  func.func @transform_2(%arg0: i32) -> (i32, i32) {
    %c0_i32 = arith.constant 0 : i32
    %c0_i32_0 = arith.constant 0 : i32
    %c0_i32_1 = arith.constant 0 : i32
    return %c0_i32, %c0_i32_0 : i32, i32
  }
  func.func @transform_3(%arg0: i32) -> (i32, i32) {
    %c0_i32 = arith.constant 0 : i32
    %c0_i32_0 = arith.constant 0 : i32
    %c0_i32_1 = arith.constant 0 : i32
    return %c0_i32, %c0_i32_0 : i32, i32
  }
  func.func @transform_4(%arg0: i32) -> (i32, i32) {
    %c0_i32 = arith.constant 0 : i32
    %c0_i32_0 = arith.constant 0 : i32
    %c0_i32_1 = arith.constant 0 : i32
    return %c0_i32, %c0_i32_0 : i32, i32
  }
  func.func @transform_5(%arg0: i32) -> (i32, i32) {
    %c0_i32 = arith.constant 0 : i32
    %c0_i32_0 = arith.constant 0 : i32
    %c0_i32_1 = arith.constant 0 : i32
    return %c0_i32, %c0_i32_0 : i32, i32
  }
  func.func @transform_6(%arg0: i32) -> (i32, i32) {
    %c0_i32 = arith.constant 0 : i32
    %c0_i32_0 = arith.constant 0 : i32
    %c0_i32_1 = arith.constant 0 : i32
    return %c0_i32, %c0_i32_0 : i32, i32
  }
  func.func @transform_7(%arg0: i32) -> i32 {
    %c0_i32 = arith.constant 0 : i32
    %c0_i32_0 = arith.constant 0 : i32
    return %c0_i32 : i32
  }
  func.func @transform_8(%arg0: i32) -> (i32, i32) {
    %c0_i32 = arith.constant 0 : i32
    %c0_i32_0 = arith.constant 0 : i32
    return %c0_i32, %arg0 : i32, i32
  }
}

</mosaic_0001>

<bundles_post_ra>
// kernel: tpu_custom_call.1
= control target key start
LH: loop header
LB: loop body
LE: loop exit
PB: predicated region body
PF: predicated region fallthrough
CT: control target
= control target key end

     0   :  { %14 = vsyncpa [#allocation4], 0  ;;  %s830_s0 = inlined_call_operand.hbm [shape: f32[8,8], index: 0, kind: input, shape index: {}]   ;;  %s831_s1 = inlined_call_operand.hbm [shape: f32[8,8], index: 1, kind: input, shape index: {}]   ;;  %s832_s2 = inlined_call_operand.hbm [shape: bf16[16,256], index: 2, kind: input, shape index: {}]   ;;  %s833_s3 = inlined_call_operand.vmem [shape: f32[1,256], index: 3, kind: input, shape index: {}]   ;;  %s834_s4 = inlined_call_operand.hbm [shape: bf16[256,256], index: 4, kind: input, shape index: {}]   ;;  %s835_s5 = inlined_call_operand.vmem [shape: f32[1,256], index: 5, kind: input, shape index: {}]   ;;  %s836_s6 = inlined_call_operand.vmem [shape: f32[1,256], index: 6, kind: input, shape index: {}]   ;;  %s837_s7 = inlined_call_operand.<no memory space> [shape: f32[1], index: 7, kind: input, shape index: {}]   ;;  %s838_s8 = inlined_call_operand.hbm [shape: f32[1,8], index: 8, kind: output, shape index: {}]  }
   0x1   :  { %15 = vsyncpa [#allocation7], 0 }
   0x2   :  { %16 = vsyncpa [#allocation10], 0  ;;  %s34_s29 = sshll.u32 %s831_s1, 4  ;;  %s35_s29 = int_to_ptr.hbm [resolvable:$true] %s34_s29 }
   0x3   :  { %17 = vsyncpa [#allocation5], 0  ;;  %s751_s30 = smov [#allocation6]   ;;  %s23_s12 = sshll.u32 %s830_s0, 4  ;;  %s24_s12 = int_to_ptr.hbm [resolvable:$true] %s23_s12 }
   0x4   :  { %s36_s9 = sshll.u32 %s751_s30, 4  ;;  %s752_s13 = smov [#allocation3]   ;;  %s37_s9 = int_to_ptr.vmem [resolvable:$true] %s36_s9 }
   0x5   :  { %39 = dma.hbm_to_vmem [thread:$0]  %s35_s29, 128, %s37_s9, [#allocation7]  }
   0x6   :  { %s25_s14 = sshll.u32 %s752_s13, 4  ;;  %s44_s17 = sshll.u32 %s832_s2, 4  ;;  %s26_s14 = int_to_ptr.vmem [resolvable:$true] %s25_s14  ;;  %s45_s17 = int_to_ptr.hbm [resolvable:$true] %s44_s17 }
   0x7   :  { %28 = dma.hbm_to_vmem [thread:$0]  %s24_s12, 128, %s26_s14, [#allocation4]  }
   0x8   :  { %s753_s1 = smov [#allocation8]   ;;  %s59_s21 = sshll.u32 %s834_s4, 4  ;;  %s60_s21 = int_to_ptr.hbm [resolvable:$true] %s59_s21 }
   0x9   :  { %s46_s18 = sshll.u32 %s753_s1, 4  ;;  %s754_s22 = smov 128   ;;  %s47_s18 = int_to_ptr.vmem [resolvable:$true] %s46_s18 }
   0xa   :  { %s755_s0 = smov 8   ;;  %s756_s23 = smov [#allocation9]  }
   0xb   :  { %52 = dma.hbm_to_vmem [thread:$0]  %s45_s17, 256, %s47_s18, [#allocation7], %s754_s22, %s754_s22, %s755_s0  }
   0xc   :  { %s61_s24 = sshll.u32 %s756_s23, 4  ;;  %s62_s24 = int_to_ptr.vmem [resolvable:$true] %s61_s24 }
   0xd   :  { %67 = dma.hbm_to_vmem [thread:$0]  %s60_s21, 4096, %s62_s24, [#allocation10], %s754_s22, %s754_s22, %s755_s0  }
   0xe   :  { %743 = dma.done.wait [#allocation4], 128  }
   0xf   :  { %744 = vsyncadd [#allocation4], 4294967168 }
  0x10   :  { %745 = dma.done.wait [#allocation7], 384  }
  0x11   :  { %746 = vsyncadd [#allocation7], 4294966912 }
  0x12   :  { %747 = dma.done.wait [#allocation10], 4096  }
  0x13   :  { %748 = vsyncadd [#allocation10], 4294963200  ;;  %v92_v0 = vld [vmem:[#allocation6] sm:$0xff]  ;;  %v446_v1 = vld [vmem:[#allocation8] sm:$0xf]  ;;  %vm97_vm0 = vcmask 64512  }
  0x14   :  { %94 = vrot.lane.b32.xlu0 %v92_v0, %s755_s0  ;;  %v583_v2 = vld [vmem:[#allocation8 + $0x4] sm:$0xf0]  ;;  %v582_v3 = vld [vmem:[#allocation8 + $0x4] sm:$0xf]  ;;  %v448_v5 = vld [vmem:[#allocation8 + $0x8] sm:$0xf0] }
  0x15   :  { %v447_v4 = vor.u32 %v583_v2, %v446_v1  ;;  %v451_v6 = vor.u32 %v582_v3, %v448_v5  ;;  %v512_v7 = vld [vmem:[#allocation9 + $0x70] sm:$0xf]  ;;  %v599_v8 = vld [vmem:[#allocation9 + $0x74] sm:$0xf0]  ;;  %v598_v12 = vld [vmem:[#allocation9 + $0x74] sm:$0xf] }
  0x16   :  { %v576_v9 = vld [vmem:[#allocation9 + $0xf0] sm:$0xf]  ;;  %v513_v10 = vor.u32 %v599_v8, %v512_v7  ;;  %v615_v11 = vld [vmem:[#allocation9 + $0xf4] sm:$0xf0]  ;;  %v514_v13 = vld [vmem:[#allocation9 + $0x78] sm:$0xf0] }
  0x17   :  { %129 = vmatpush.bf16.msra.mxu0 %v447_v4  ;;  %142 = vmatpush.bf16.msra.mxu1 %v451_v6  ;;  %v577_v14 = vor.u32 %v615_v11, %v576_v9  ;;  %v517_v15 = vor.u32 %v598_v12, %v514_v13  ;;  %v614_v16 = vld [vmem:[#allocation9 + $0xf4] sm:$0xf]  ;;  %v578_v17 = vld [vmem:[#allocation9 + $0xf8] sm:$0xf0]  ;;  %v504_v18 = vld [vmem:[#allocation9 + $0x60] sm:$0xf] }
  0x18   :  { %350 = vmatpush.bf16.msra.mxu2 %v513_v10  ;;  %v581_v19 = vor.u32 %v614_v16, %v578_v17  ;;  %v597_v20 = vld [vmem:[#allocation9 + $0x64] sm:$0xf0]  ;;  %v568_v21 = vld [vmem:[#allocation9 + $0xe0] sm:$0xf]  ;;  %v596_v25 = vld [vmem:[#allocation9 + $0x64] sm:$0xf] }
  0x19   :  { %v613_v22 = vld [vmem:[#allocation9 + $0xe4] sm:$0xf0]  ;;  %363 = vmatpush.bf16.msra.mxu3 %v577_v14  ;;  %v505_v23 = vor.u32 %v597_v20, %v504_v18  ;;  %v506_v26 = vld [vmem:[#allocation9 + $0x68] sm:$0xf0]  ;;  %v612_v27 = vld [vmem:[#allocation9 + $0xe4] sm:$0xf] }
  0x1a   :  { %v569_v24 = vor.u32 %v613_v22, %v568_v21  ;;  %v509_v28 = vor.u32 %v596_v25, %v506_v26  ;;  %v570_v29 = vld [vmem:[#allocation9 + $0xe8] sm:$0xf0]  ;;  %v496_v30 = vld [vmem:[#allocation9 + $0x50] sm:$0xf]  ;;  %v595_v31 = vld [vmem:[#allocation9 + $0x54] sm:$0xf0] }
  0x1b   :  { %376 = vmatpush.bf16.msrb.mxu0 %v517_v15  ;;  %389 = vmatpush.bf16.msrb.mxu1 %v581_v19  ;;  %v573_v32 = vor.u32 %v612_v27, %v570_v29  ;;  %v560_v33 = vld [vmem:[#allocation9 + $0xd0] sm:$0xf]  ;;  %v611_v34 = vld [vmem:[#allocation9 + $0xd4] sm:$0xf0]  ;;  %v594_v35 = vld [vmem:[#allocation9 + $0x54] sm:$0xf]  ;;  %v497_v36 = vor.u32 %v595_v31, %v496_v30 }
  0x1c   :  { %351 = vmatpush.bf16.msra.mxu2 %v505_v23  ;;  %v498_v37 = vld [vmem:[#allocation9 + $0x58] sm:$0xf0]  ;;  %v610_v38 = vld [vmem:[#allocation9 + $0xd4] sm:$0xf]  ;;  %v561_v40 = vor.u32 %v611_v34, %v560_v33  ;;  %v488_v42 = vld [vmem:[#allocation9 + $0x40] sm:$0xf] }
  0x1d   :  { %v562_v39 = vld [vmem:[#allocation9 + $0xd8] sm:$0xf0]  ;;  %364 = vmatpush.bf16.msra.mxu3 %v569_v24  ;;  %v501_v41 = vor.u32 %v594_v35, %v498_v37  ;;  %v593_v43 = vld [vmem:[#allocation9 + $0x44] sm:$0xf0]  ;;  %v552_v44 = vld [vmem:[#allocation9 + $0xc0] sm:$0xf] }
  0x1e   :  { %v565_v45 = vor.u32 %v610_v38, %v562_v39  ;;  %v609_v46 = vld [vmem:[#allocation9 + $0xc4] sm:$0xf0]  ;;  %v592_v47 = vld [vmem:[#allocation9 + $0x44] sm:$0xf]  ;;  %v490_v48 = vld [vmem:[#allocation9 + $0x48] sm:$0xf0]  ;;  %v489_v51 = vor.u32 %v593_v43, %v488_v42 }
  0x1f   :  { %377 = vmatpush.bf16.msrb.mxu0 %v509_v28  ;;  %390 = vmatpush.bf16.msrb.mxu1 %v573_v32  ;;  %v608_v49 = vld [vmem:[#allocation9 + $0xc4] sm:$0xf]  ;;  %v554_v50 = vld [vmem:[#allocation9 + $0xc8] sm:$0xf0]  ;;  %v553_v52 = vor.u32 %v609_v46, %v552_v44  ;;  %v493_v53 = vor.u32 %v592_v47, %v490_v48  ;;  %v480_v54 = vld [vmem:[#allocation9 + $0x30] sm:$0xf] }
  0x20   :  { %352 = vmatpush.bf16.msra.mxu2 %v497_v36  ;;  %v591_v55 = vld [vmem:[#allocation9 + $0x34] sm:$0xf0]  ;;  %v544_v56 = vld [vmem:[#allocation9 + $0xb0] sm:$0xf]  ;;  %v557_v57 = vor.u32 %v608_v49, %v554_v50  ;;  %v590_v59 = vld [vmem:[#allocation9 + $0x34] sm:$0xf] }
  0x21   :  { %365 = vmatpush.bf16.msra.mxu3 %v561_v40  ;;  %v607_v58 = vld [vmem:[#allocation9 + $0xb4] sm:$0xf0]  ;;  %v482_v60 = vld [vmem:[#allocation9 + $0x38] sm:$0xf0]  ;;  %v606_v61 = vld [vmem:[#allocation9 + $0xb4] sm:$0xf]  ;;  %v481_v63 = vor.u32 %v591_v55, %v480_v54 }
  0x22   :  { %v546_v62 = vld [vmem:[#allocation9 + $0xb8] sm:$0xf0]  ;;  %v545_v0 = vor.u32 %v607_v58, %v544_v56  ;;  %v485_v1 = vor.u32 %v590_v59, %v482_v60  ;;  %v472_v2 = vld [vmem:[#allocation9 + $0x20] sm:$0xf]  ;;  %v589_v3 = vld [vmem:[#allocation9 + $0x24] sm:$0xf0] }
  0x23   :  { %378 = vmatpush.bf16.msrb.mxu0 %v501_v41  ;;  %391 = vmatpush.bf16.msrb.mxu1 %v565_v45  ;;  %v536_v4 = vld [vmem:[#allocation9 + $0xa0] sm:$0xf]  ;;  %v549_v5 = vor.u32 %v606_v61, %v546_v62  ;;  %v605_v6 = vld [vmem:[#allocation9 + $0xa4] sm:$0xf0]  ;;  %v588_v7 = vld [vmem:[#allocation9 + $0x24] sm:$0xf]  ;;  %v473_v11 = vor.u32 %v589_v3, %v472_v2 }
  0x24   :  { %353 = vmatpush.bf16.msra.mxu2 %v489_v51  ;;  %v474_v8 = vld [vmem:[#allocation9 + $0x28] sm:$0xf0]  ;;  %v604_v9 = vld [vmem:[#allocation9 + $0xa4] sm:$0xf]  ;;  %v537_v12 = vor.u32 %v605_v6, %v536_v4  ;;  %vm118_vm1 = vcmask 130048   ;;  %s432_s10 = sshll.u32 %s838_s8, 4  ;;  %s433_s10 = int_to_ptr.hbm [resolvable:$true] %s432_s10 }
  0x25   :  { %366 = vmatpush.bf16.msra.mxu3 %v553_v52  ;;  %v538_v10 = vld [vmem:[#allocation9 + $0xa8] sm:$0xf0]  ;;  %v477_v13 = vor.u32 %v588_v7, %v474_v8  ;;  %v91_v15 = vld [vmem:[#allocation3] sm:$0xff]  ;;  %v464_v19 = vld [vmem:[#allocation9 + $0x10] sm:$0xf]  ;;  %vm423_vm2 = vcmask 57344  }
  0x26   :  { %v541_v14 = vor.u32 %v604_v9, %v538_v10  ;;  %v587_v20 = vld [vmem:[#allocation9 + $0x14] sm:$0xf0]  ;;  %v528_v21 = vld [vmem:[#allocation9 + $0x90] sm:$0xf]  ;;  %v586_v24 = vld [vmem:[#allocation9 + $0x14] sm:$0xf] }
  0x27   :  { %379 = vmatpush.bf16.msrb.mxu0 %v493_v53  ;;  %392 = vmatpush.bf16.msrb.mxu1 %v557_v57  ;;  %v465_v22 = vor.u32 %v587_v20, %v464_v19  ;;  %v603_v23 = vld [vmem:[#allocation9 + $0x94] sm:$0xf0]  ;;  %v466_v25 = vld [vmem:[#allocation9 + $0x18] sm:$0xf0]  ;;  %v602_v28 = vld [vmem:[#allocation9 + $0x94] sm:$0xf] }
  0x28   :  { %354 = vmatpush.bf16.msra.mxu2 %v481_v63  ;;  %v529_v26 = vor.u32 %v603_v23, %v528_v21  ;;  %v469_v27 = vor.u32 %v586_v24, %v466_v25  ;;  %v530_v29 = vld [vmem:[#allocation9 + $0x98] sm:$0xf0]  ;;  %v456_v31 = vld [vmem:[#allocation9] sm:$0xf]  ;;  %v585_v32 = vld [vmem:[#allocation9 + $0x4] sm:$0xf0] }
  0x29   :  { %367 = vmatpush.bf16.msra.mxu3 %v545_v0  ;;  %v533_v30 = vor.u32 %v602_v28, %v530_v29  ;;  %v520_v33 = vld [vmem:[#allocation9 + $0x80] sm:$0xf]  ;;  %v457_v34 = vor.u32 %v585_v32, %v456_v31  ;;  %v601_v35 = vld [vmem:[#allocation9 + $0x84] sm:$0xf0]  ;;  %v584_v36 = vld [vmem:[#allocation9 + $0x4] sm:$0xf] }
  0x2a   :  { %v458_v37 = vld [vmem:[#allocation9 + $0x8] sm:$0xf0]  ;;  %v521_v38 = vor.u32 %v601_v35, %v520_v33  ;;  %v600_v40 = vld [vmem:[#allocation9 + $0x84] sm:$0xf]  ;;  %v102_v43 = vld [vmem:[%s833_s3] sm:$0x3] }
  0x2b   :  { %380 = vmatpush.bf16.msrb.mxu0 %v485_v1  ;;  %393 = vmatpush.bf16.msrb.mxu1 %v549_v5  ;;  %v461_v39 = vor.u32 %v584_v36, %v458_v37  ;;  %v522_v41 = vld [vmem:[#allocation9 + $0x88] sm:$0xf0]  ;;  %v104_v44 = vperm.slane %v102_v43, 0  ;;  %v105_v45 = vperm.slane %v102_v43, 1  ;;  %v184_v56 = vld [vmem:[%s835_s5] sm:$0x3] }
  0x2c   :  { %355 = vmatpush.bf16.msra.mxu2 %v473_v11  ;;  %v525_v42 = vor.u32 %v600_v40, %v522_v41  ;;  %v187_v57 = vperm.slane %v184_v56, 1  ;;  %v186_v61 = vperm.slane %v184_v56, 0  ;;  %v404_v63 = vld [vmem:[%s836_s6] sm:$0x3]  ;;  %s757_s6 = smov [#allocation11]  }
  0x2d   :  { %368 = vmatpush.bf16.msra.mxu3 %v537_v12  ;;  %v407_v4 = vperm.slane %v404_v63, 1  ;;  %v406_v6 = vperm.slane %v404_v63, 0  ;;  %s430_s29 = sshll.u32 %s757_s6, 4  ;;  %s431_s29 = int_to_ptr.vmem [resolvable:$true] %s430_s29 }
  0x2f   :  { %381 = vmatpush.bf16.msrb.mxu0 %v477_v13  ;;  %394 = vmatpush.bf16.msrb.mxu1 %v541_v14 }
  0x30   :  { %356 = vmatpush.bf16.msra.mxu2 %v465_v22 }
  0x31   :  { %369 = vmatpush.bf16.msra.mxu3 %v529_v26 }
  0x33   :  { %382 = vmatpush.bf16.msrb.mxu0 %v469_v27  ;;  %395 = vmatpush.bf16.msrb.mxu1 %v533_v30 }
  0x34   :  { %357 = vmatpush.bf16.msra.mxu2 %v457_v34 }
  0x35   :  { %370 = vmatpush.bf16.msra.mxu3 %v521_v38 }
  0x37   :  { %383 = vmatpush.bf16.msrb.mxu0 %v461_v39  ;;  %396 = vmatpush.bf16.msrb.mxu1 %v525_v42 }
  0x86   :  { %v95_v16 = vpop.permute.xlu0 %94 }
  0x87   :  { %v98_v17 = vsel %vm97_vm0, %v91_v15, %v95_v16  ;;  %v419_v15 = vlaneseq  ;;  %v416_v16 = vstv %s837_s7 }
  0x88   :  { %v99_v18 = vpack.c.bf16 %v98_v17, %v98_v17 }
  0x89   :  { %v420_v17 = vand.u32 127, %v419_v15 }
  0x8a   :  { %452 = vmatmul.msk.bf16.vlgmr.msra.gmra.mxu0 %vm118_vm1, %v99_v18  ;;  %453 = vmatmul.msk.bf16.vlgmr.msra.gmra.mxu1 %vm118_vm1, %v99_v18 }
 0x107   :  { %v131_v46 = vpop.f32.mrf.mxu0  ;;  %v144_v47 = vpop.f32.mrf.mxu1 }
 0x108   :  { %v132_v48 = vadd.f32 %v131_v46, %v104_v44  ;;  %v145_v49 = vadd.f32 %v144_v47, %v105_v45 }
 0x10a   :  { %v148_v50 = vmax.f32 %v132_v48, 0.0  ;;  %v149_v51 = vmax.f32 %v145_v49, 0.0 }
 0x10c   :  { %v150_v52 = vpack.c.bf16 %v148_v50, %v148_v50  ;;  %v151_v53 = vpack.c.bf16 %v149_v51, %v149_v51 }
 0x10e   :  { %358 = vmatmul.bf16.vlgmr.msra.gmra.mxu2 %v150_v52  ;;  %371 = vmatmul.bf16.vlgmr.msra.gmra.mxu3 %v151_v53 }
 0x10f   :  { %384 = vmatmul.bf16.vlgmr.msrb.gmra.mxu0 %v150_v52  ;;  %397 = vmatmul.bf16.vlgmr.msrb.gmra.mxu1 %v151_v53  ;;  %v133_v54 = vpop.f32.mrf.mxu0  ;;  %v146_v55 = vpop.f32.mrf.mxu1 }
 0x18c   :  { %v385_v58 = vpop.f32.mrf.mxu0  ;;  %v398_v59 = vpop.f32.mrf.mxu1 }
 0x18d   :  { %v386_v60 = vadd.f32 %v385_v58, %v187_v57 }
 0x18f   :  { %v399_v62 = vadd.f32 %v398_v59, %v386_v60 }
 0x191   :  { %v359_v0 = vpop.f32.mrf.mxu2  ;;  %v372_v1 = vpop.f32.mrf.mxu3  ;;  %v403_v3 = vmax.f32 %v399_v62, 0.0 }
 0x192   :  { %v360_v2 = vadd.f32 %v359_v0, %v186_v61 }
 0x193   :  { %v411_v10 = vmul.f32 %v407_v4, %v403_v3 }
 0x194   :  { %v373_v5 = vadd.f32 %v372_v1, %v360_v2  ;;  %v387_v7 = vpop.f32.mrf.mxu0  ;;  %v400_v8 = vpop.f32.mrf.mxu1 }
 0x196   :  { %v402_v9 = vmax.f32 %v373_v5, 0.0 }
 0x198   :  { %v410_v11 = vmul.f32 %v406_v6, %v402_v9 }
 0x199   :  { %v361_v12 = vpop.f32.mrf.mxu2  ;;  %v374_v13 = vpop.f32.mrf.mxu3 }
 0x19a   :  { %v412_v14 = vadd.f32 %v411_v10, %v410_v11 }
 0x19c   :  { %413 = vadd.xlane.f32.xlu0 %v412_v14 }
 0x20f   :  { %v414_v18 = vpop.xlane.xlu0 %413 }
 0x210   :  { %v417_v19 = vadd.f32 %v416_v16, %v414_v18 }
 0x212   :  { %v421_v20 = vperm.slane %v417_v19, %v420_v17 }
 0x214   :  { %424 = vst.msk [vmem:[#allocation11] sm:$0x1] %vm423_vm2, %v421_v20 }
 0x215   :  { %435 = dma.vmem_to_hbm [thread:$0]  %s431_s29, 16, %s433_s10, [#allocation5]  }
 0x216   :  { %749 = dma.done.wait [#allocation5], 16  }
 0x217   :  { %750 = vsyncadd [#allocation5], 4294967280 }
 0x218   :  { %440 = vsyncpa [#allocation4], 1 }
 0x219   :  { %441 = vsyncpa [#allocation7], 1 }
 0x21a   :  { %442 = vsyncpa [#allocation10], 1 }
 0x21b   :  { %443 = vsyncpa [#allocation5], 1 }

</bundles_post_ra>
